<compile_context>
chip_gen: v7x
topology: tpu7x:2x2x1
jax: 0.10.0
libtpu: 0.0.40
codegen_flags: <defaults>
</compile_context>

<pallas_src>
import jax
import jax.numpy as jnp
from jax import lax
from jax.experimental import pallas as pl
from jax.experimental.pallas import tpu as pltpu


def _pick_seq_tile(S):
    """Largest tile (multiple of 8, <=256) dividing S; fall back to S for tiny S."""
    for ts in (256, 128, 64, 32, 16, 8):
        if S % ts == 0:
            return ts
    return S  # odd/small S: single tile per sequence (masked edges handled by Pallas)


def _make_kernel(S, TS, eps):
    def kernel(wid_ref,              # [B*S] int32 scalar-prefetch (SMEM) word ids
               tid_ref,              # (TS, 1) int32 token-type id column for this tile
               tt_ref,               # (2, H)  token-type table (VMEM resident)
               pos_ref,              # (TS, H) contiguous position rows for this tile
               gamma_ref, beta_ref,  # (1, H)  LayerNorm params
               word_hbm,             # [V, H]  word table, left in HBM (pl.ANY)
               out_ref,              # (TS, H) output tile (batch dim squeezed)
               wbuf,                 # (TS, H) VMEM scratch for gathered word rows
               sem):                 # (TS,)   DMA semaphores (one per in-flight row)
        b = pl.program_id(0)
        j = pl.program_id(1)
        base = b * S + j * TS        # flat index of the first token in this tile

        # Launch all TS word-row gathers; many in-flight small DMAs hide HBM latency.
        @pl.loop(0, TS)
        def _start(i):
            row = wid_ref[base + i]
            pltpu.make_async_copy(word_hbm.at[pl.ds(row, 1), :],
                                  wbuf.at[pl.ds(i, 1), :],
                                  sem.at[i]).start()

        @pl.loop(0, TS)
        def _wait(i):
            pltpu.make_async_copy(word_hbm.at[pl.ds(0, 1), :],
                                  wbuf.at[pl.ds(i, 1), :],
                                  sem.at[i]).wait()

        word = wbuf[...].astype(jnp.float32)                    # (TS, H)
        pos = pos_ref[...].astype(jnp.float32)                  # (TS, H)

        # Token-type embedding: 0/1 arithmetic select against the resident table.
        t = tid_ref[...].astype(jnp.float32)                    # (TS, 1), values in {0, 1}
        tt0 = tt_ref[0:1, :].astype(jnp.float32)                # (1, H)
        tt1 = tt_ref[1:2, :].astype(jnp.float32)                # (1, H)
        x = word + pos + tt0 * (1.0 - t) + tt1 * t              # (TS, H)

        # LayerNorm over the hidden dimension (biased variance, like torch).
        h = x.shape[-1]
        mean = jnp.sum(x, axis=-1, keepdims=True) / h
        centered = x - mean
        var = jnp.sum(centered * centered, axis=-1, keepdims=True) / h
        inv = lax.rsqrt(var + eps)
        y = centered * inv * gamma_ref[...] + beta_ref[...]

        # Dropout: identity at inference time.
        # TODO(synk): training-mode dropout (needs pltpu.prng_* + keep-mask) not emitted.
        out_ref[...] = y.astype(out_ref.dtype)

    return kernel


def bert_embeddings_forward(input_ids, token_type_ids, params, *, eps=1e-12):
    """input_ids, token_type_ids: [B, S] int32.  Returns [B, S, H] float32."""
    word_emb = params["word_embeddings"]        # [V, H]
    pos_emb = params["position_embeddings"]     # [max_seq, H]
    tt_emb = params["token_type_embeddings"]    # [2, H]
    gamma = params["ln_gamma"].reshape(1, -1)   # [1, H]
    beta = params["ln_beta"].reshape(1, -1)     # [1, H]

    B, S = input_ids.shape
    V, H = word_emb.shape
    max_seq = pos_emb.shape[0]
    assert S <= max_seq, "sequence length exceeds position table"

    TS = _pick_seq_tile(S)
    nj = S // TS
    n_tok = B * S

    # Clamp ids on the host so the manual gather can never DMA out of range.
    wid = jnp.clip(input_ids.reshape(-1).astype(jnp.int32), 0, V - 1)      # [B*S]
    if token_type_ids is None:
        tid = jnp.zeros((n_tok, 1), jnp.int32)
    else:
        tid = jnp.clip(token_type_ids.reshape(-1, 1).astype(jnp.int32), 0, 1)  # [B*S, 1]

    grid_spec = pltpu.PrefetchScalarGridSpec(
        num_scalar_prefetch=1,
        grid=(B, nj),
        in_specs=[
            # token-type id column for this tile
            pl.BlockSpec((TS, 1), lambda b, j, wid: (b * nj + j, 0)),
            # [2, H] token-type table: same block every step -> VMEM resident
            pl.BlockSpec((2, H), lambda b, j, wid: (0, 0)),
            # contiguous position rows (no gather needed)
            pl.BlockSpec((TS, H), lambda b, j, wid: (j, 0)),
            # LayerNorm params
            pl.BlockSpec((1, H), lambda b, j, wid: (0, 0)),
            pl.BlockSpec((1, H), lambda b, j, wid: (0, 0)),
            # word table stays in HBM; gathered manually inside the kernel
            pl.BlockSpec(memory_space=pl.ANY),
        ],
        out_specs=pl.BlockSpec((None, TS, H), lambda b, j, wid: (b, j, 0)),
        scratch_shapes=[
            pltpu.VMEM((TS, H), word_emb.dtype),
            pltpu.SemaphoreType.DMA((TS,)),
        ],
    )

    cost = pl.CostEstimate(
        flops=10 * n_tok * H,
        transcendentals=n_tok,
        bytes_accessed=3 * n_tok * H * 4,
    )

    out = pl.pallas_call(
        _make_kernel(S, TS, eps),
        grid_spec=grid_spec,
        out_shape=jax.ShapeDtypeStruct((B, S, H), jnp.float32),
        compiler_params=pltpu.CompilerParams(
            dimension_semantics=("parallel", "parallel")),
        cost_estimate=cost,
    )(wid, tid, tt_emb, pos_emb, gamma, beta, word_emb)

    return out


def init_params(key, vocab_size, max_seq, hidden):
    k1, k2, k3 = jax.random.split(key, 3)
    scale = 0.02
    return {
        "word_embeddings": scale * jax.random.normal(k1, (vocab_size, hidden), jnp.float32),
        "position_embeddings": scale * jax.random.normal(k2, (max_seq, hidden), jnp.float32),
        "token_type_embeddings": scale * jax.random.normal(k3, (2, hidden), jnp.float32),
        "ln_gamma": jnp.ones((hidden,), jnp.float32),
        "ln_beta": jnp.zeros((hidden,), jnp.float32),
    }


def reference_forward(input_ids, token_type_ids, params, eps=1e-12):
    B, S = input_ids.shape
    pos_ids = jnp.broadcast_to(jnp.arange(S, dtype=jnp.int32)[None, :], (B, S))
    x = (params["word_embeddings"][input_ids]
         + params["position_embeddings"][pos_ids]
         + params["token_type_embeddings"][token_type_ids])
    mean = jnp.mean(x, axis=-1, keepdims=True)
    var = jnp.mean((x - mean) ** 2, axis=-1, keepdims=True)
    y = (x - mean) * jax.lax.rsqrt(var + eps)
    return y * params["ln_gamma"] + params["ln_beta"]


if __name__ == "__main__":
    # Small synthetic config: vocab=64, max_seq=16, batch=2, seq=8, hidden=32.
    VOCAB, MAX_SEQ, B, S, H = 64, 16, 2, 8, 32
    EPS = 1e-12

    key = jax.random.PRNGKey(0)
    kp, ki, kt = jax.random.split(key, 3)

    params = init_params(kp, VOCAB, MAX_SEQ, H)
    input_ids = jax.random.randint(ki, (B, S), 0, VOCAB, dtype=jnp.int32)
    token_type_ids = jax.random.randint(kt, (B, S), 0, 2, dtype=jnp.int32)

    out = bert_embeddings_forward(input_ids, token_type_ids, params, eps=EPS)
    out = jax.block_until_ready(out)

    ref = reference_forward(input_ids, token_type_ids, params, eps=EPS)
    assert out.shape == (B, S, H)
    assert jnp.allclose(out, ref, atol=1e-5, rtol=1e-5), "mismatch vs reference"

    print("KERNEL_OK")
</pallas_src>

<mosaic_0001>
module attributes {stable_mosaic.version = 11 : i64} {
  func.func @kernel(%arg0: i32, %arg1: i32, %arg2: memref<16xi32, #tpu.memory_space<smem>>, %arg3: memref<8x1xi32, #tpu.memory_space<vmem>>, %arg4: memref<2x32xf32, #tpu.memory_space<vmem>>, %arg5: memref<8x32xf32, #tpu.memory_space<vmem>>, %arg6: memref<1x32xf32, #tpu.memory_space<vmem>>, %arg7: memref<1x32xf32, #tpu.memory_space<vmem>>, %arg8: memref<64x32xf32, #tpu.memory_space<any>>, %arg9: memref<1x8x32xf32, #tpu.memory_space<vmem>>, %arg10: memref<8x32xf32, #tpu.memory_space<vmem>>, %arg11: memref<8x!tpu.dma_semaphore, #tpu.memory_space<semaphore_mem>>) attributes {dimension_semantics = [#tpu.dimension_semantics<parallel>, #tpu.dimension_semantics<parallel>], iteration_bounds = array<i64: 2, 1>, scalar_prefetch = 1 : i64, scratch_operands = 2 : i64, tpu.core_type = #tpu.core_type<tc>, window_params = [{transform_indices = @transform_0, window_bounds = array<i64: 8, 1>}, {pipeline_mode = #tpu.pipeline_mode<synchronous>, transform_indices = @transform_1, window_bounds = array<i64: 2, 32>}, {transform_indices = @transform_2, window_bounds = array<i64: 8, 32>}, {pipeline_mode = #tpu.pipeline_mode<synchronous>, transform_indices = @transform_3, window_bounds = array<i64: 1, 32>}, {pipeline_mode = #tpu.pipeline_mode<synchronous>, transform_indices = @transform_4, window_bounds = array<i64: 1, 32>}, {}, {transform_indices = @transform_6, window_bounds = array<i64: 1, 8, 32>}]} {
    %c8_i32 = arith.constant 8 : i32
    %0 = arith.muli %arg0, %c8_i32 : i32
    %c8_i32_0 = arith.constant 8 : i32
    %1 = arith.muli %arg1, %c8_i32_0 : i32
    %2 = arith.addi %0, %1 : i32
    %c0_i32 = arith.constant 0 : i32
    %c8_i32_1 = arith.constant 8 : i32
    %3 = arith.addi %c0_i32, %c8_i32_1 : i32
    %c1_i32 = arith.constant 1 : i32
    scf.for %arg12 = %c0_i32 to %3 step %c1_i32  : i32 {
      %c1_i32_27 = arith.constant 1 : i32
      %47 = arith.muli %arg12, %c1_i32_27 : i32
      %c0_i32_28 = arith.constant 0 : i32
      %48 = arith.addi %c0_i32_28, %47 : i32
      %49 = arith.addi %2, %48 : i32
      %50 = arith.index_cast %49 : i32 to index
      %51 = memref.load %arg2[%50] : memref<16xi32, #tpu.memory_space<smem>>
      %c0_i32_29 = arith.constant 0 : i32
      %52 = tpu.memref_slice %arg8[%51, %c0_i32_29] : memref<64x32xf32, #tpu.memory_space<any>> -> memref<1x32xf32, #tpu.memory_space<any>>
      %c0_i32_30 = arith.constant 0 : i32
      %53 = tpu.memref_slice %arg10[%48, %c0_i32_30] : memref<8x32xf32, #tpu.memory_space<vmem>> -> memref<1x32xf32, #tpu.memory_space<vmem>>
      %54 = tpu.memref_slice %arg11[%48] : memref<8x!tpu.dma_semaphore, #tpu.memory_space<semaphore_mem>> -> memref<1x!tpu.dma_semaphore, #tpu.memory_space<semaphore_mem>>
      %55 = tpu.memref_squeeze %54 : memref<1x!tpu.dma_semaphore, #tpu.memory_space<semaphore_mem>> -> memref<!tpu.dma_semaphore, #tpu.memory_space<semaphore_mem>>
      tpu.enqueue_dma source(%52 : memref<1x32xf32, #tpu.memory_space<any>>) target(%53 : memref<1x32xf32, #tpu.memory_space<vmem>>) target_semaphore(%55 : memref<!tpu.dma_semaphore, #tpu.memory_space<semaphore_mem>>)
    }
    %c8_i32_2 = arith.constant 8 : i32
    %c0_i32_3 = arith.constant 0 : i32
    %c8_i32_4 = arith.constant 8 : i32
    %4 = arith.addi %c0_i32_3, %c8_i32_4 : i32
    %c1_i32_5 = arith.constant 1 : i32
    scf.for %arg12 = %c0_i32_3 to %4 step %c1_i32_5  : i32 {
      %c1_i32_27 = arith.constant 1 : i32
      %47 = arith.muli %arg12, %c1_i32_27 : i32
      %c0_i32_28 = arith.constant 0 : i32
      %48 = arith.addi %c0_i32_28, %47 : i32
      %c0_i32_29 = arith.constant 0 : i32
      %c0_i32_30 = arith.constant 0 : i32
      %49 = tpu.memref_slice %arg8[%c0_i32_29, %c0_i32_30] : memref<64x32xf32, #tpu.memory_space<any>> -> memref<1x32xf32, #tpu.memory_space<any>>
      %c0_i32_31 = arith.constant 0 : i32
      %50 = tpu.memref_slice %arg10[%48, %c0_i32_31] : memref<8x32xf32, #tpu.memory_space<vmem>> -> memref<1x32xf32, #tpu.memory_space<vmem>>
      %51 = tpu.memref_slice %arg11[%48] : memref<8x!tpu.dma_semaphore, #tpu.memory_space<semaphore_mem>> -> memref<1x!tpu.dma_semaphore, #tpu.memory_space<semaphore_mem>>
      %52 = tpu.memref_squeeze %51 : memref<1x!tpu.dma_semaphore, #tpu.memory_space<semaphore_mem>> -> memref<!tpu.dma_semaphore, #tpu.memory_space<semaphore_mem>>
      tpu.wait_dma2 semaphore(%52 : memref<!tpu.dma_semaphore, #tpu.memory_space<semaphore_mem>>) src(%49 : memref<1x32xf32, #tpu.memory_space<any>>) dst(%50 : memref<1x32xf32, #tpu.memory_space<vmem>>)
    }
    %c8_i32_6 = arith.constant 8 : i32
    %c0 = arith.constant 0 : index
    %c0_7 = arith.constant 0 : index
    %5 = vector.load %arg10[%c0, %c0_7] : memref<8x32xf32, #tpu.memory_space<vmem>>, vector<8x32xf32>
    %c0_8 = arith.constant 0 : index
    %c0_9 = arith.constant 0 : index
    %6 = vector.load %arg5[%c0_8, %c0_9] : memref<8x32xf32, #tpu.memory_space<vmem>>, vector<8x32xf32>
    %c0_10 = arith.constant 0 : index
    %c0_11 = arith.constant 0 : index
    %7 = vector.load %arg3[%c0_10, %c0_11] : memref<8x1xi32, #tpu.memory_space<vmem>>, vector<8x1xi32>
    %8 = arith.sitofp %7 : vector<8x1xi32> to vector<8x1xf32>
    %c0_12 = arith.constant 0 : index
    %c0_13 = arith.constant 0 : index
    %9 = vector.load %arg4[%c0_12, %c0_13] : memref<2x32xf32, #tpu.memory_space<vmem>>, vector<1x32xf32>
    %c1 = arith.constant 1 : index
    %c0_14 = arith.constant 0 : index
    %10 = vector.load %arg4[%c1, %c0_14] : memref<2x32xf32, #tpu.memory_space<vmem>>, vector<1x32xf32>
    %11 = arith.addf %5, %6 : vector<8x32xf32>
    %cst = arith.constant 1.000000e+00 : f32
    %12 = vector.broadcast %cst : f32 to vector<8x1xf32>
    %13 = arith.subf %12, %8 : vector<8x1xf32>
    %14 = vector.broadcast %9 : vector<1x32xf32> to vector<8x32xf32>
    %15 = vector.broadcast %13 : vector<8x1xf32> to vector<8x32xf32>
    %16 = arith.mulf %14, %15 : vector<8x32xf32>
    %17 = arith.addf %11, %16 : vector<8x32xf32>
    %18 = vector.broadcast %10 : vector<1x32xf32> to vector<8x32xf32>
    %19 = vector.broadcast %8 : vector<8x1xf32> to vector<8x32xf32>
    %20 = arith.mulf %18, %19 : vector<8x32xf32>
    %21 = arith.addf %17, %20 : vector<8x32xf32>
    %cst_15 = arith.constant dense<0.000000e+00> : vector<8xf32>
    %22 = vector.multi_reduction <add>, %21, %cst_15 [1] : vector<8x32xf32> to vector<8xf32>
    %23 = vector.shape_cast %22 : vector<8xf32> to vector<8x1xf32>
    %cst_16 = arith.constant 3.200000e+01 : f32
    %24 = vector.broadcast %cst_16 : f32 to vector<8x1xf32>
    %25 = arith.divf %23, %24 : vector<8x1xf32>
    %26 = vector.broadcast %25 : vector<8x1xf32> to vector<8x32xf32>
    %27 = arith.subf %21, %26 : vector<8x32xf32>
    %28 = arith.mulf %27, %27 : vector<8x32xf32>
    %cst_17 = arith.constant dense<0.000000e+00> : vector<8xf32>
    %29 = vector.multi_reduction <add>, %28, %cst_17 [1] : vector<8x32xf32> to vector<8xf32>
    %30 = vector.shape_cast %29 : vector<8xf32> to vector<8x1xf32>
    %cst_18 = arith.constant 3.200000e+01 : f32
    %31 = vector.broadcast %cst_18 : f32 to vector<8x1xf32>
    %32 = arith.divf %30, %31 : vector<8x1xf32>
    %cst_19 = arith.constant 9.99999996E-13 : f32
    %33 = vector.broadcast %cst_19 : f32 to vector<8x1xf32>
    %34 = arith.addf %32, %33 : vector<8x1xf32>
    %35 = math.rsqrt %34 : vector<8x1xf32>
    %36 = vector.broadcast %35 : vector<8x1xf32> to vector<8x32xf32>
    %37 = arith.mulf %27, %36 : vector<8x32xf32>
    %c0_20 = arith.constant 0 : index
    %c0_21 = arith.constant 0 : index
    %38 = vector.load %arg6[%c0_20, %c0_21] : memref<1x32xf32, #tpu.memory_space<vmem>>, vector<1x32xf32>
    %39 = vector.broadcast %38 : vector<1x32xf32> to vector<8x32xf32>
    %40 = arith.mulf %37, %39 : vector<8x32xf32>
    %c0_22 = arith.constant 0 : index
    %c0_23 = arith.constant 0 : index
    %41 = vector.load %arg7[%c0_22, %c0_23] : memref<1x32xf32, #tpu.memory_space<vmem>>, vector<1x32xf32>
    %42 = vector.broadcast %41 : vector<1x32xf32> to vector<8x32xf32>
    %43 = arith.addf %40, %42 : vector<8x32xf32>
    %c0_24 = arith.constant 0 : index
    %c0_25 = arith.constant 0 : index
    %c0_26 = arith.constant 0 : index
    %44 = vector.load %arg9[%c0_24, %c0_25, %c0_26] : memref<1x8x32xf32, #tpu.memory_space<vmem>>, vector<1x8x32xf32>
    %45 = vector.shape_cast %44 : vector<1x8x32xf32> to vector<8x32xf32>
    %46 = vector.shape_cast %43 : vector<8x32xf32> to vector<1x8x32xf32>
    tpu.vector_store %arg9[%c0_24, %c0_25, %c0_26], %46 {strides = array<i32>} : memref<1x8x32xf32, #tpu.memory_space<vmem>>, vector<1x8x32xf32>,
    return
  }
  func.func @transform_0(%arg0: i32, %arg1: i32, %arg2: memref<16xi32, #tpu.memory_space<smem>>) -> (i32, i32) {
    %c1_i32 = arith.constant 1 : i32
    %0 = arith.muli %arg0, %c1_i32 : i32
    %1 = arith.addi %0, %arg1 : i32
    %c0_i32 = arith.constant 0 : i32
    %c0_i32_0 = arith.constant 0 : i32
    return %1, %c0_i32 : i32, i32
  }
  func.func @transform_1(%arg0: i32, %arg1: i32, %arg2: memref<16xi32, #tpu.memory_space<smem>>) -> (i32, i32) {
    %c0_i32 = arith.constant 0 : i32
    %c0_i32_0 = arith.constant 0 : i32
    %c0_i32_1 = arith.constant 0 : i32
    return %c0_i32, %c0_i32_0 : i32, i32
  }
  func.func @transform_2(%arg0: i32, %arg1: i32, %arg2: memref<16xi32, #tpu.memory_space<smem>>) -> (i32, i32) {
    %c0_i32 = arith.constant 0 : i32
    %c0_i32_0 = arith.constant 0 : i32
    return %arg1, %c0_i32 : i32, i32
  }
  func.func @transform_3(%arg0: i32, %arg1: i32, %arg2: memref<16xi32, #tpu.memory_space<smem>>) -> (i32, i32) {
    %c0_i32 = arith.constant 0 : i32
    %c0_i32_0 = arith.constant 0 : i32
    %c0_i32_1 = arith.constant 0 : i32
    return %c0_i32, %c0_i32_0 : i32, i32
  }
  func.func @transform_4(%arg0: i32, %arg1: i32, %arg2: memref<16xi32, #tpu.memory_space<smem>>) -> (i32, i32) {
    %c0_i32 = arith.constant 0 : i32
    %c0_i32_0 = arith.constant 0 : i32
    %c0_i32_1 = arith.constant 0 : i32
    return %c0_i32, %c0_i32_0 : i32, i32
  }
  func.func @transform_6(%arg0: i32, %arg1: i32, %arg2: memref<16xi32, #tpu.memory_space<smem>>) -> (i32, i32, i32) {
    %c0_i32 = arith.constant 0 : i32
    %c0_i32_0 = arith.constant 0 : i32
    return %arg0, %arg1, %c0_i32 : i32, i32, i32
  }
}

</mosaic_0001>

<bundles_post_ra>
// kernel: tpu_custom_call.1
= control target key start
LH: loop header
LB: loop body
LE: loop exit
PB: predicated region body
PF: predicated region fallthrough
CT: control target
= control target key end

     0   :  { %s977_s0 = inlined_call_operand.vmem [shape: s32[16], index: 0, kind: input, shape index: {}]   ;;  %s978_s1 = inlined_call_operand.vmem [shape: s32[16,1], index: 1, kind: input, shape index: {}]   ;;  %s979_s2 = inlined_call_operand.vmem [shape: f32[2,32], index: 2, kind: input, shape index: {}]   ;;  %s980_s3 = inlined_call_operand.vmem [shape: f32[16,32], index: 3, kind: input, shape index: {}]   ;;  %s981_s4 = inlined_call_operand.vmem [shape: f32[1,32], index: 4, kind: input, shape index: {}]   ;;  %s982_s5 = inlined_call_operand.vmem [shape: f32[1,32], index: 5, kind: input, shape index: {}]   ;;  %s983_s6 = inlined_call_operand.vmem [shape: f32[64,32], index: 6, kind: input, shape index: {}]   ;;  %s984_s7 = inlined_call_operand.hbm [shape: f32[2,8,32], index: 7, kind: output, shape index: {}]  }
   0x1   :  { %s12_s26 = sshll.u32 %s977_s0, 4  ;;  %s13_s26 = int_to_ptr.vmem [resolvable:$true] %s12_s26 }
   0x2   :  { %s674_s27 = scalar_lea.vmem %s13_s26, 16  ;;  %p679_p1 = scmp.lt.s32.totalorder %s13_s26, %s13_s26 }
   0x3   :  { %p675_p0 = scmp.ne.s32.totalorder %s13_s26, %s674_s27  ;;  %p680_p2 = scmp.lt.s32.totalorder %s674_s27, %s674_s27 }
   0x5   :  { %p681_p3 = por %p680_p2, %p679_p1 }
   0x7   :  { %p682_p4 = pnand %p681_p3, %p675_p0 }
   0x9   :  { %685 = shalt.err (!%p682_p4)  }
   0xa   :  { %s786_s28 = smov [#allocation5]  }
   0xb   :  { %15 = dma.vmem_to_smem %s13_s26, 16, %s786_s28, [#allocation4] }
   0xc   :  { %746 = dma.done.wait [#allocation4], 16 }
   0xd   :  { %747 = vsyncadd [#allocation4], 4294967280 }
   0xe   :  { %17 = sfence }
   0xf   :  { %18 = vsyncpa [#allocation7], 0 }
  0x10   :  { %20 = vsyncpa [#allocation7 + $0x1], 0  ;;  %s832_s29 = smov 0   ;;  %s834_s30 = smov 0  }
  0x11   :  { %s836_s0 = smov 0   ;;  %s838_s8 = smov 0  }
  0x12   :  { %s840_s9 = smov 0   ;;  %s842_s10 = smov 0  }
  0x13 LB: > { %988 = sst [smem:[#allocation12_spill]] %s772_s9  ;;  %s573_s11 = sadd.s32 4294967295, %s776_s10   ;;  %s776_s10 = sphi %s842_s10, %s26_s10   ;;  %s772_s9 = sphi %s840_s9, %s994_s9   ;;  %s768_s8 = sphi %s838_s8, %s993_s8   ;;  %s764_s0 = sphi %s836_s0, %s997_s0   ;;  %s760_s30 = sphi %s834_s30, %s996_s30   ;;  %s756_s29 = sphi %s832_s29, %s995_s29  }
  0x14   : > { %s574_s12 = sadd.s32 4294967294, %s776_s10   ;;  %s38_s13 = sadd.s32 1, %s772_s9 }
  0x15   : > { %s164_s14 = sadd.s32 1, %s764_s0  ;;  %p40_p5 = scmp.ge.s32.totalorder %s38_s13, 2 }
  0x16   : > { %p174_p6 = scmp.ne.s32.totalorder %s764_s0, %s760_s30  ;;  %p175_p7 = scmp.eq.s32.totalorder %s573_s11, 1 }
  0x17   : > { %p180_p8 = scmp.ne.s32.totalorder %s760_s30, %s756_s29  ;;  %s999_s13 = smov (%p40_p5, %s38_s13), 0 }
  0x18   : > { %989 = sst [smem:[#allocation13_spill]] %s999_s13  ;;  %p872_p9 = por %p175_p7, %p174_p6 }
  0x19   : > { %p181_p10 = scmp.eq.s32.totalorder %s574_s12, 1  ;;  %s159_s16 = ssub.s32 %s772_s9, %s999_s13 }
  0x1a   : > { %p578_p11 = scmp.ge.s32.totalorder %s776_s10, 1  ;;  %p162_p12 = scmp.eq.s32.totalorder %s159_s16, 0 }
  0x1b   : > { %p879_p13 = por %p181_p10, %p180_p8  ;;  %p224_p0 = scmp.lt.s32.totalorder %s776_s10, 3 }
  0x1c   : > { %s885_s18 = scalar_select %p162_p12, %s764_s0, %s164_s14  }
  0x1d   : > { %p225_p1 = pnand %p578_p11, %p224_p0 }
  0x1e   : > { %s985_s19 = sand.u32 (!%p225_p1), 1, %s760_s30   ;;  %p257_p2 = scmp.lt.s32.totalorder (!%p225_p1), %s768_s8, 1 }
  0x1f   : > { %228 = sbr.rel (%p225_p1) target bundleno = 534 (0x216), region = 40  ;;  %s891_s20 = sshll.u32 (!%p225_p1), %s985_s19, 3 }
  0x20   : > { %s581_s21 = sshll.u32 (!%p225_p1), %s768_s8, 3  ;;  %s255_s27 = scalar_lea.vmem (!%p225_p1), [#allocation6], %s891_s20 }
  0x21   : > { %s778_s28 = smov (!%p225_p1), 0  }
  0x26   : > { %s258_s22 = scalar_select %p257_p2, %s768_s8, 1 }
  0x28   : > { %s580_s23 = sshll.u32 %s258_s22, 3 }
  0x29   : > { %s260_s26 = scalar_lea.vmem %s978_s1, %s580_s23 }
  0x2a LB: >> { %s275_s11 = sadd.s32 %s780_s28, %s581_s21  ;;  %s278_s13 = scalar_lea.vmem [#allocation2], %s780_s28  ;;  %s780_s28 = sphi %s778_s28, %s274_s28  }
  0x2b   : >> { %s276_s12 = sld [smem:[#allocation5 + %s275_s11]]  ;;  %s279_s9 = scalar_lea.sflag [#allocation3], %s780_s28 }
  0x31   : >> { %s277_s19 = scalar_lea.vmem %s983_s6, %s276_s12 }
  0x32   : >> { %v297_v0 = vld [vmem:[%s277_s19] sm:$0x1] }
  0x33   : >> { %298 = vst [vmem:[%s278_s13] sm:$0x1] %v297_v0 }
  0x34   : >> { %323 = vsyncadd %s279_s9, 16  ;;  %s274_s28 = sadd.s32 1, %s780_s28  }
  0x35   : >> { %p271_p3 = scmp.ge.s32.totalorder %s274_s28, 8  }
  0x36   : > { %s782_s22 = smov (%p271_p3), 0  }
  0x37   : > { %273 = sbr.rel (!%p271_p3) target bundleno = 42 (0x2a), region = 143 }
  0x3e LB: >> { %s330_s23 = scalar_lea.sflag [#allocation3], %s784_s22  ;;  %s784_s22 = sphi %s782_s22, %s329_s22  }
  0x3f   : >> { %748 = dma.done.wait %s330_s23, 16 }
  0x40   : >> { %749 = vsyncadd %s330_s23, 4294967280  ;;  %s329_s22 = sadd.s32 1, %s784_s22  }
  0x41   : >> { %p326_p4 = scmp.ge.s32.totalorder %s329_s22, 8  }
  0x42   : > { %v336_v1 = vld [vmem:[%s260_s26] sm:$0xff] (%p326_p4)  ;;  %v787_v2 = vmov (%p326_p4), 0   ;;  %vm364_vm0 = vcmask (%p326_p4), 261120   ;;  %s587_s14 = sshll.u32 (%p326_p4), %s768_s8, 7  ;;  %s411_s16 = sshll.u32 (%p326_p4), %s255_s27, 4  ;;  %s927_s16 = int_to_ptr.vmem [resolvable:$true] %s411_s16 }
  0x43   : > { %328 = sbr.rel (!%p326_p4) target bundleno = 62 (0x3e), region = 154  ;;  %671 = vset.pattern.permute.xlu0 (%p326_p4), %v787_v2  ;;  %v337_v3 = vcvt.s32.f32 (%p326_p4), %v336_v1  ;;  %v582_v5 = vld [vmem:[%s979_s2] ss:$0 sm:$0xff] (%p326_p4)  ;;  %v583_v11 = vld [vmem:[%s979_s2 + $0x1] ss:$0 sm:$0xff] (%p326_p4)  ;;  %s925_s9 = scalar_lea.hbm (%p326_p4), %s984_s7, %s587_s14 }
  0x44   : > { %v334_v6 = vld [vmem:[#allocation2] sm:$0xff] (%p326_p4)  ;;  %s992_s13 = sand.u32 (%p326_p4), 1, %s760_s30   ;;  %s686_s8 = scalar_lea.vmem (%p326_p4), %s927_s16, 128 }
  0x45   : > { %v341_v4 = vsub.f32 (%p326_p4), 1.0, %v337_v3  ;;  %v335_v7 = vld [vmem:[%s980_s3] sm:$0xff] (%p326_p4)  ;;  %s397_s19 = scalar_lea.sflag (%p326_p4), [#allocation7], %s992_s13  ;;  %p687_p5 = scmp.ne.s32.totalorder (%p326_p4), %s927_s16, %s686_s8 }
  0x46   : > { %v340_v9 = vadd.f32 (%p326_p4), %v335_v7, %v334_v6  ;;  %v584_v26 = vld [vmem:[%s981_s4] ss:$0 sm:$0xff] (%p326_p4)  ;;  %s788_s21 = smov (%p326_p4), [#allocation6]  }
  0x47   : > { %348 = vperm.xlu0 (%p326_p4), %671, %v341_v4   ;;  %v585_v28 = vld [vmem:[%s982_s5] ss:$0 sm:$0xff] (%p326_p4)  ;;  %p688_p6 = pnand (%p326_p4), %p687_p5, %p872_p9  ;;  %s690_s24 = sshll.u32 (%p326_p4), %s788_s21, 4  ;;  %s691_s24 = int_to_ptr.vmem [resolvable:$false] %s690_s24 }
  0x48   : > { %s692_s25 = scalar_lea.vmem (%p326_p4), %s691_s24, 256  ;;  %p693_p8 = scmp.lt.s32.totalorder (%p326_p4), %s927_s16, %s691_s24 }
  0x49   : > { %p689_p7 = pneg (%p326_p4), %p688_p6  ;;  %p694_p10 = scmp.lt.s32.totalorder (%p326_p4), %s692_s25, %s686_s8 }
  0x4b   : > { %359 = vperm.xlu0 %671, %v337_v3   ;;  %p695_p11 = por %p694_p10, %p693_p8 }
  0x4d   : > { %p696_p12 = pnand %p695_p11, %p689_p7 }
  0xc6   : > { %v349_v8 = vpop.permute.xlu0 %348 }
  0xc7   : > { %v351_v10 = vmul.f32 %v582_v5, %v349_v8 }
  0xc9   : > { %v352_v13 = vadd.f32 %v351_v10, %v340_v9 }
  0xca   : > { %v360_v12 = vpop.permute.xlu0 %359 }
  0xcb   : > { %v362_v14 = vmul.f32 %v583_v11, %v360_v12 }
  0xcd   : > { %v363_v15 = vadd.f32 %v362_v14, %v352_v13 }
  0xcf   : > { %v365_v16 = vsel %vm364_vm0, %v363_v15, 0.0 }
  0xd0   : > { %366 = vadd.xlane.f32.xlu1 %v365_v16 }
 0x15d   : > { %v367_v17 = vpop.xlane.xlu1 %366 }
 0x15e   : > { %v369_v18 = vmul.f32 0.03125, %v367_v17 }
 0x160   : > { %v370_v19 = vsub.f32 %v363_v15, %v369_v18 }
 0x162   : > { %v371_v20 = vmul.f32 %v370_v19, %v370_v19 }
 0x164   : > { %v372_v21 = vsel %vm364_vm0, %v371_v20, 0.0 }
 0x165   : > { %373 = vadd.xlane.f32.xlu1 %v372_v21 }
 0x1f2   : > { %v374_v22 = vpop.xlane.xlu1 %373 }
 0x1f3   : > { %v375_v23 = vmul.f32 0.03125, %v374_v22 }
 0x1f5   : > { %v376_v24 = vadd.f32 1e-12, %v375_v23 }
 0x1f7   : > { %672 = vrsqrt.f32 %v376_v24 }
 0x201   : > { %v673_v25 = vpop.eup %672 }
 0x202   : > { %v378_v27 = vmul.f32 %v673_v25, %v370_v19 }
 0x204   : > { %v386_v29 = vmul.f32 %v584_v26, %v378_v27 }
 0x206   : > { %v394_v30 = vadd.f32 %v585_v28, %v386_v29 }
 0x208   : > { %395 = vst.msk [vmem:[%s255_s27] sm:$0xff] %vm364_vm0, %v394_v30 }
 0x209   : > { %699 = shalt.err (!%p696_p12)
}
 0x20a   : > { %s700_s20 = scalar_lea.hbm %s925_s9, 128  ;;  %s704_s28 = scalar_lea.hbm %s984_s7, 256 }
 0x20b   : > { %p701_p0 = scmp.ne.s32.totalorder %s925_s9, %s700_s20  ;;  %p705_p3 = scmp.lt.u32.totalorder %s925_s9, %s984_s7 }
 0x20c   : > { %p706_p4 = scmp.lt.u32.totalorder %s704_s28, %s700_s20  ;;  %p708_p6 = scmp.lt.u32.totalorder %s700_s20, %s925_s9 }
 0x20d   : > { %p702_p1 = pnand %p701_p0, %p872_p9 }
 0x20e   : > { %p707_p5 = por %p706_p4, %p705_p3 }
 0x20f   : > { %p703_p2 = pneg %p702_p1 }
 0x210   : > { %p709_p7 = por %p708_p6, %p707_p5 }
 0x212   : > { %p710_p8 = pnand %p709_p7, %p703_p2 }
 0x214   : > { %713 = shalt.err (!%p710_p8)
}
 0x215   : > { %598 = dma.vmem_to_hbm [thread:$0]  (%p872_p9), %s927_s16, 128, %s925_s9, %s397_s19  }
 0x216 PF: > { %p604_p10 = scmp.ge.s32.totalorder %s776_s10, 2  ;;  %s423_s14 = sand.u32 1, %s756_s29  }
 0x217   : > { %s424_s22 = scalar_lea.sflag [#allocation7], %s423_s14 }
 0x218   : > { %p601_p11 = pnand %p604_p10, %p879_p13 }
 0x21a   : > { %751 = dma.done.wait (!%p601_p11), %s424_s22, 128  }
 0x21b   : > { %753 = vsyncadd (!%p601_p11), %s424_s22, 4294967168  ;;  %s26_s10 = sadd.s32 1, %s776_s10   ;;  %s993_s8 = sld [smem:[#allocation12_spill]] }
 0x21c   : > { %p23_p12 = scmp.ge.s32.totalorder %s26_s10, 4   ;;  %s994_s9 = sld [smem:[#allocation13_spill]] }
 0x21d   : > { %s995_s29 = smov %s760_s30  ;;  %s996_s30 = smov %s764_s0 }
 0x21e   : > { %s997_s0 = smov %s885_s18  ;;  %25 = sbr.rel (!%p23_p12) target bundleno = 19 (0x13), region = 165 }
 0x225   :  { %429 = vsyncpa [#allocation7], 1 }
 0x226   :  { %431 = vsyncpa [#allocation7 + $0x1], 1 }
 0x227   :  { %432 = vsyncmov [#allocation3] }
 0x22a   :  { %s433_s15 = vpop.sfrf %432 }
 0x22b   :  { %p590_p9 = scmp.ne.s32.totalorder %s433_s15, 0 }
 0x22d   :  { %437 = shalt.err (%p590_p9)  }
 0x22e   :  { %439 = vsyncmov [#allocation3 + $0x1] }
 0x231   :  { %s440_s17 = vpop.sfrf %439 }
 0x232   :  { %p591_p13 = scmp.ne.s32.totalorder %s440_s17, 0 }
 0x234   :  { %444 = shalt.err (%p591_p13)  }
 0x235   :  { %446 = vsyncmov [#allocation3 + $0x2] }
 0x238   :  { %s447_s16 = vpop.sfrf %446 }
 0x239   :  { %p592_p0 = scmp.ne.s32.totalorder %s447_s16, 0 }
 0x23b   :  { %451 = shalt.err (%p592_p0)  }
 0x23c   :  { %453 = vsyncmov [#allocation3 + $0x3] }
 0x23f   :  { %s454_s18 = vpop.sfrf %453 }
 0x240   :  { %p593_p1 = scmp.ne.s32.totalorder %s454_s18, 0 }
 0x242   :  { %458 = shalt.err (%p593_p1)  }
 0x243   :  { %460 = vsyncmov [#allocation3 + $0x4] }
 0x246   :  { %s461_s10 = vpop.sfrf %460 }
 0x247   :  { %p594_p2 = scmp.ne.s32.totalorder %s461_s10, 0 }
 0x249   :  { %465 = shalt.err (%p594_p2)  }
 0x24a   :  { %467 = vsyncmov [#allocation3 + $0x5] }
 0x24d   :  { %s468_s1 = vpop.sfrf %467 }
 0x24e   :  { %p595_p3 = scmp.ne.s32.totalorder %s468_s1, 0 }
 0x250   :  { %472 = shalt.err (%p595_p3)  }
 0x251   :  { %474 = vsyncmov [#allocation3 + $0x6] }
 0x254   :  { %s475_s2 = vpop.sfrf %474 }
 0x255   :  { %p596_p4 = scmp.ne.s32.totalorder %s475_s2, 0 }
 0x257   :  { %479 = shalt.err (%p596_p4)  }
 0x258   :  { %481 = vsyncmov [#allocation3 + $0x7] }
 0x25b   :  { %s482_s3 = vpop.sfrf %481 }
 0x25c   :  { %p597_p5 = scmp.ne.s32.totalorder %s482_s3, 0 }
 0x25e   :  { %486 = shalt.err (%p597_p5)  }

</bundles_post_ra>
